<compile_context>
chip_gen: v7x
topology: tpu7x:2x2x1
jax: 0.10.0
libtpu: 0.0.40
codegen_flags: <defaults>
</compile_context>

<pallas_src>
import functools

import jax
import jax.numpy as jnp
from jax.experimental import pallas as pl
from jax.experimental.pallas import tpu as pltpu


def _agent_kernel(x_ref, u_ref, w1_ref, b1_ref, w2_ref, b2_ref, wd_ref, bd_ref,
                  logp_ref, act_ref):
    # x_ref : (4, TB)    state^T tile (batch on the lane axis)
    # u_ref : (1, TB)    uniform samples in [0, 1)
    # w1_ref: (128, 4)   W1^T                     (f32, resident)
    # b1_ref: (128, 1)   b1                        (f32, resident)
    # w2_ref: (128,128)  W2^T                      (bf16, resident)
    # b2_ref: (128, 1)   b2                        (f32, resident)
    # wd_ref: (1, 128)   (W3[:,1] - W3[:,0])^T     (f32, resident)
    # bd_ref: (1, 1)     b3[1] - b3[0]
    h1 = jnp.dot(w1_ref[...], x_ref[...], preferred_element_type=jnp.float32)  # (128, TB)
    h1 = jnp.maximum(h1 + b1_ref[...], 0.0)
    h1 = h1.astype(w2_ref.dtype)                                               # bf16 for the MXU fast path
    h2 = jnp.dot(w2_ref[...], h1, preferred_element_type=jnp.float32)          # (128, TB) f32 accum
    h2 = jnp.maximum(h2 + b2_ref[...], 0.0)

    # d = logit1 - logit0, shape (1, TB); everything below is lane-dense.
    d = jnp.dot(wd_ref[...], h2, preferred_element_type=jnp.float32) + bd_ref[...]

    # Two-class categorical, closed form.  One exp feeds both paths:
    #   t  = exp(-|d|)
    #   p0 = sigmoid(-d) = { t/(1+t)  if d >= 0 ;  1/(1+t)  if d < 0 }
    #   action = 1  iff  p0 < u                       (inverse CDF, strict <)
    #   log p_a = -softplus(+-d) = -(max(s,0) + log(1+t)),  s = -d if a==1 else d
    u = u_ref[...]
    t = jnp.exp(-jnp.abs(d))
    r = pl.reciprocal(1.0 + t, approx=True)           # EUP slot; divide-free
    p0 = jnp.where(d >= 0.0, t * r, r)
    take1 = p0 < u                                     # (1, TB) bool

    s = jnp.where(take1, -d, d)
    logp_ref[...] = -(jnp.maximum(s, 0.0) + jnp.log(1.0 + t))
    act_ref[...] = take1.astype(jnp.int32)


def pack_params(w1, b1, w2, b2, w3, b3, *, w2_dtype=jnp.bfloat16):
    """Repack nn.Linear-style params ((in,out) weights, (out,) biases) into the
    kernel's lane-dense transposed layout.  W2 is stored in bf16 (f32 accum in
    the kernel); pass w2_dtype=jnp.float32 if full precision is required."""
    w1t = w1.T.astype(jnp.float32)                     # (128, 4)
    b1c = b1.reshape(128, 1).astype(jnp.float32)
    w2t = w2.T.astype(w2_dtype)                        # (128, 128)
    b2c = b2.reshape(128, 1).astype(jnp.float32)
    wd = (w3[:, 1] - w3[:, 0]).reshape(1, 128).astype(jnp.float32)
    b3f = b3.reshape(-1).astype(jnp.float32)
    bd = (b3f[1] - b3f[0]).reshape(1, 1)
    return w1t, b1c, w2t, b2c, wd, bd


def _tile_plan(B, tb, min_grid_steps):
    """Pick (TB, n_steps, Bp): TB multiple of 128, padding-minimizing, n_steps>=min."""
    tiles = (B + 127) // 128                  # number of 128-wide lane tiles
    n = max(min_grid_steps, -(-tiles * 128 // tb))
    n = min(n, tiles)                         # never more steps than 128-tiles
    TB = (-(-tiles // n)) * 128               # ceil(tiles/n) * 128
    return TB, n, n * TB


def agent_forward_t(state_t, params, uniform, *, tb=8192, min_grid_steps=1):
    """Features-major entry point: state_t is (4, B) f32, uniform is (B,) f32 in [0,1).
    Avoids the wrapper-side transpose pass.  Returns (log_prob (B,), action (B,) int32).

    tb: target batch tile (lanes per grid step).  Default 8192 keeps the per-step
        live set ~11 MiB (fits the 32 MiB scoped VMEM limit on v5e/v6e/v7x) while
        amortizing per-step overhead ~8x vs 1024.
    min_grid_steps: set to 2 on v7x so both TensorCores get work for mid-size batches.
    """
    w1t, b1c, w2t, b2c, wd, bd = params
    B = state_t.shape[1]
    TB, n_steps, Bp = _tile_plan(B, tb, min_grid_steps)

    xT = jnp.pad(state_t.astype(jnp.float32), ((0, 0), (0, Bp - B)))
    u = jnp.pad(uniform.astype(jnp.float32).reshape(1, B), ((0, 0), (0, Bp - B)))

    logp, act = pl.pallas_call(
        _agent_kernel,
        out_shape=(
            jax.ShapeDtypeStruct((1, Bp), jnp.float32),
            jax.ShapeDtypeStruct((1, Bp), jnp.int32),
        ),
        grid=(n_steps,),
        in_specs=[
            pl.BlockSpec((4, TB), lambda i: (0, i)),        # state^T tile (streamed)
            pl.BlockSpec((1, TB), lambda i: (0, i)),        # uniform tile (streamed)
            pl.BlockSpec((128, 4), lambda i: (0, 0)),       # W1^T   (resident broadcast)
            pl.BlockSpec((128, 1), lambda i: (0, 0)),       # b1
            pl.BlockSpec((128, 128), lambda i: (0, 0)),     # W2^T   (bf16)
            pl.BlockSpec((128, 1), lambda i: (0, 0)),       # b2
            pl.BlockSpec((1, 128), lambda i: (0, 0)),       # wd = W3[:,1]-W3[:,0]
            pl.BlockSpec((1, 1), lambda i: (0, 0)),         # bd = b3[1]-b3[0]
        ],
        out_specs=(
            pl.BlockSpec((1, TB), lambda i: (0, i)),
            pl.BlockSpec((1, TB), lambda i: (0, i)),
        ),
        compiler_params=pltpu.CompilerParams(
            dimension_semantics=("parallel",),
            vmem_limit_bytes=32 * 1024 * 1024),
    )(xT, u, w1t, b1c, w2t, b2c, wd, bd)

    return logp[0, :B], act[0, :B]


def agent_forward(state, params, uniform, *, tb=8192, min_grid_steps=1):
    """Batch-major entry point matching the PyTorch module: state is (B, 4)."""
    return agent_forward_t(state.T, params, uniform, tb=tb,
                           min_grid_steps=min_grid_steps)


def init_raw_params(key):
    """nn.Linear default init: U[-1/sqrt(fan_in), 1/sqrt(fan_in)].
    Weights stored (in_features, out_features); biases 1-D."""
    dims = [(4, 128), (128, 128), (128, 2)]
    params = []
    for (fin, fout) in dims:
        key, kw, kb = jax.random.split(key, 3)
        bound = 1.0 / jnp.sqrt(jnp.float32(fin))
        w = jax.random.uniform(kw, (fin, fout), jnp.float32, -bound, bound)
        b = jax.random.uniform(kb, (fout,), jnp.float32, -bound, bound)
        params += [w, b]
    return tuple(params)


# TODO(synk): Agent.value (critic head) is not part of forward(); omitted here.


if __name__ == "__main__":
    key = jax.random.PRNGKey(0)
    kp, kx, ku = jax.random.split(key, 3)

    raw = init_raw_params(kp)
    packed = pack_params(*raw)                  # W2 in bf16 (f32 accum in kernel)

    B = 8
    state = jax.random.normal(kx, (B, 4), jnp.float32)       # CartPole-like obs
    uniform = jax.random.uniform(ku, (B,), jnp.float32)      # sampling randomness

    fwd = jax.jit(functools.partial(agent_forward, params=packed))
    log_prob, action = fwd(state, uniform=uniform)
    jax.block_until_ready((log_prob, action))

    # ---- validate against a pure-JAX f32 reference of the same forward ----
    w1, b1, w2, b2, w3, b3 = raw
    h1 = jnp.maximum(state @ w1 + b1, 0.0)
    h2 = jnp.maximum(h1 @ w2 + b2, 0.0)
    logits = h2 @ w3 + b3
    logp_all = jax.nn.log_softmax(logits, axis=-1)
    ref_logp_of_act = jnp.take_along_axis(logp_all, action[:, None], axis=-1)[:, 0]

    assert log_prob.shape == (B,) and log_prob.dtype == jnp.float32
    assert action.shape == (B,) and action.dtype == jnp.int32
    assert bool(jnp.all((action >= 0) & (action <= 1)))
    assert bool(jnp.all(jnp.isfinite(log_prob)))
    assert bool(jnp.all(log_prob <= 1e-6))
    # Tolerance relaxed to 2e-2 because the middle matmul uses bf16 operands
    # (f32 accumulation); with f32 W2 (pack_params(..., w2_dtype=jnp.float32))
    # this path agrees to ~1e-5.
    assert bool(jnp.all(jnp.abs(log_prob - ref_logp_of_act) < 2e-2))

    print("KERNEL_OK")
</pallas_src>

<mosaic_0001>
module attributes {stable_mosaic.version = 11 : i64} {
  func.func @_agent_kernel(%arg0: i32, %arg1: memref<4x128xf32, #tpu.memory_space<vmem>>, %arg2: memref<1x128xf32, #tpu.memory_space<vmem>>, %arg3: memref<128x4xf32, #tpu.memory_space<vmem>>, %arg4: memref<128x1xf32, #tpu.memory_space<vmem>>, %arg5: memref<128x128xbf16, #tpu.memory_space<vmem>>, %arg6: memref<128x1xf32, #tpu.memory_space<vmem>>, %arg7: memref<1x128xf32, #tpu.memory_space<vmem>>, %arg8: memref<1x1xf32, #tpu.memory_space<vmem>>, %arg9: memref<1x128xf32, #tpu.memory_space<vmem>>, %arg10: memref<1x128xi32, #tpu.memory_space<vmem>>) attributes {dimension_semantics = [#tpu.dimension_semantics<parallel>], iteration_bounds = array<i64: 1>, scalar_prefetch = 0 : i64, scratch_operands = 0 : i64, tpu.core_type = #tpu.core_type<tc>, window_params = [{transform_indices = @transform_0, window_bounds = array<i64: 4, 128>}, {transform_indices = @transform_1, window_bounds = array<i64: 1, 128>}, {pipeline_mode = #tpu.pipeline_mode<synchronous>, transform_indices = @transform_2, window_bounds = array<i64: 128, 4>}, {pipeline_mode = #tpu.pipeline_mode<synchronous>, transform_indices = @transform_3, window_bounds = array<i64: 128, 1>}, {pipeline_mode = #tpu.pipeline_mode<synchronous>, transform_indices = @transform_4, window_bounds = array<i64: 128, 128>}, {pipeline_mode = #tpu.pipeline_mode<synchronous>, transform_indices = @transform_5, window_bounds = array<i64: 128, 1>}, {pipeline_mode = #tpu.pipeline_mode<synchronous>, transform_indices = @transform_6, window_bounds = array<i64: 1, 128>}, {pipeline_mode = #tpu.pipeline_mode<synchronous>, transform_indices = @transform_7, window_bounds = array<i64: 1, 1>}, {transform_indices = @transform_8, window_bounds = array<i64: 1, 128>}, {transform_indices = @transform_9, window_bounds = array<i64: 1, 128>}]} {
    %c0 = arith.constant 0 : index
    %c0_0 = arith.constant 0 : index
    %0 = vector.load %arg3[%c0, %c0_0] : memref<128x4xf32, #tpu.memory_space<vmem>>, vector<128x4xf32>
    %c0_1 = arith.constant 0 : index
    %c0_2 = arith.constant 0 : index
    %1 = vector.load %arg1[%c0_1, %c0_2] : memref<4x128xf32, #tpu.memory_space<vmem>>, vector<4x128xf32>
    %cst = arith.constant dense<0.000000e+00> : vector<128x128xf32>
    %2 = tpu.matmul %0, %1, %cst {dimension_numbers = #tpu.dot_dimension_numbers<[1], [0], [0], [1], [0, 0, 1, 1], [], []>} : vector<128x4xf32>, vector<4x128xf32>, vector<128x128xf32> -> vector<128x128xf32>
    %c0_3 = arith.constant 0 : index
    %c0_4 = arith.constant 0 : index
    %3 = vector.load %arg4[%c0_3, %c0_4] : memref<128x1xf32, #tpu.memory_space<vmem>>, vector<128x1xf32>
    %4 = vector.broadcast %3 : vector<128x1xf32> to vector<128x128xf32>
    %5 = arith.addf %2, %4 : vector<128x128xf32>
    %cst_5 = arith.constant 0.000000e+00 : f32
    %6 = vector.broadcast %cst_5 : f32 to vector<128x128xf32>
    %7 = arith.maximumf %5, %6 : vector<128x128xf32>
    %8 = arith.truncf %7 : vector<128x128xf32> to vector<128x128xbf16>
    %c0_6 = arith.constant 0 : index
    %c0_7 = arith.constant 0 : index
    %9 = vector.load %arg5[%c0_6, %c0_7] : memref<128x128xbf16, #tpu.memory_space<vmem>>, vector<128x128xbf16>
    %cst_8 = arith.constant dense<0.000000e+00> : vector<128x128xf32>
    %10 = tpu.matmul %9, %8, %cst_8 {dimension_numbers = #tpu.dot_dimension_numbers<[1], [0], [0], [1], [0, 0, 1, 1], [], []>} : vector<128x128xbf16>, vector<128x128xbf16>, vector<128x128xf32> -> vector<128x128xf32>
    %c0_9 = arith.constant 0 : index
    %c0_10 = arith.constant 0 : index
    %11 = vector.load %arg6[%c0_9, %c0_10] : memref<128x1xf32, #tpu.memory_space<vmem>>, vector<128x1xf32>
    %12 = vector.broadcast %11 : vector<128x1xf32> to vector<128x128xf32>
    %13 = arith.addf %10, %12 : vector<128x128xf32>
    %cst_11 = arith.constant 0.000000e+00 : f32
    %14 = vector.broadcast %cst_11 : f32 to vector<128x128xf32>
    %15 = arith.maximumf %13, %14 : vector<128x128xf32>
    %c0_12 = arith.constant 0 : index
    %c0_13 = arith.constant 0 : index
    %16 = vector.load %arg7[%c0_12, %c0_13] : memref<1x128xf32, #tpu.memory_space<vmem>>, vector<1x128xf32>
    %cst_14 = arith.constant dense<0.000000e+00> : vector<1x128xf32>
    %17 = tpu.matmul %16, %15, %cst_14 {dimension_numbers = #tpu.dot_dimension_numbers<[1], [0], [0], [1], [0, 0, 1, 1], [], []>} : vector<1x128xf32>, vector<128x128xf32>, vector<1x128xf32> -> vector<1x128xf32>
    %c0_15 = arith.constant 0 : index
    %c0_16 = arith.constant 0 : index
    %18 = vector.load %arg8[%c0_15, %c0_16] : memref<1x1xf32, #tpu.memory_space<vmem>>, vector<1x1xf32>
    %19 = vector.broadcast %18 : vector<1x1xf32> to vector<1x128xf32>
    %20 = arith.addf %17, %19 : vector<1x128xf32>
    %c0_17 = arith.constant 0 : index
    %c0_18 = arith.constant 0 : index
    %21 = vector.load %arg2[%c0_17, %c0_18] : memref<1x128xf32, #tpu.memory_space<vmem>>, vector<1x128xf32>
    %22 = math.absf %20 : vector<1x128xf32>
    %cst_19 = arith.constant 0.000000e+00 : f32
    %23 = vector.broadcast %cst_19 : f32 to vector<1x128xf32>
    %24 = arith.subf %23, %22 : vector<1x128xf32>
    %25 = math.exp %24 : vector<1x128xf32>
    %cst_20 = arith.constant 1.000000e+00 : f32
    %26 = vector.broadcast %cst_20 : f32 to vector<1x128xf32>
    %27 = arith.addf %26, %25 : vector<1x128xf32>
    %28 = tpu.reciprocal %27 {approx = true} : vector<1x128xf32> -> vector<1x128xf32>
    %cst_21 = arith.constant 0.000000e+00 : f32
    %29 = vector.broadcast %cst_21 : f32 to vector<1x128xf32>
    %30 = arith.cmpf oge, %20, %29 : vector<1x128xf32>
    %31 = arith.mulf %25, %28 : vector<1x128xf32>
    %32 = arith.select %30, %31, %28 : vector<1x128xi1>, vector<1x128xf32>
    %33 = arith.cmpf olt, %32, %21 : vector<1x128xf32>
    %cst_22 = arith.constant 0.000000e+00 : f32
    %34 = vector.broadcast %cst_22 : f32 to vector<1x128xf32>
    %35 = arith.subf %34, %20 : vector<1x128xf32>
    %36 = arith.select %33, %35, %20 : vector<1x128xi1>, vector<1x128xf32>
    %cst_23 = arith.constant 0.000000e+00 : f32
    %37 = vector.broadcast %cst_23 : f32 to vector<1x128xf32>
    %38 = arith.maximumf %36, %37 : vector<1x128xf32>
    %cst_24 = arith.constant 1.000000e+00 : f32
    %39 = vector.broadcast %cst_24 : f32 to vector<1x128xf32>
    %40 = arith.addf %39, %25 : vector<1x128xf32>
    %41 = math.log %40 : vector<1x128xf32>
    %42 = arith.addf %38, %41 : vector<1x128xf32>
    %cst_25 = arith.constant 0.000000e+00 : f32
    %43 = vector.broadcast %cst_25 : f32 to vector<1x128xf32>
    %44 = arith.subf %43, %42 : vector<1x128xf32>
    %c0_26 = arith.constant 0 : index
    %c0_27 = arith.constant 0 : index
    %45 = vector.load %arg9[%c0_26, %c0_27] : memref<1x128xf32, #tpu.memory_space<vmem>>, vector<1x128xf32>
    tpu.vector_store %arg9[%c0_26, %c0_27], %44 {strides = array<i32>} : memref<1x128xf32, #tpu.memory_space<vmem>>, vector<1x128xf32>,
    %46 = arith.extui %33 : vector<1x128xi1> to vector<1x128xi32>
    %c0_28 = arith.constant 0 : index
    %c0_29 = arith.constant 0 : index
    %47 = vector.load %arg10[%c0_28, %c0_29] : memref<1x128xi32, #tpu.memory_space<vmem>>, vector<1x128xi32>
    tpu.vector_store %arg10[%c0_28, %c0_29], %46 {strides = array<i32>} : memref<1x128xi32, #tpu.memory_space<vmem>>, vector<1x128xi32>,
    return
  }
  func.func @transform_0(%arg0: i32) -> (i32, i32) {
    %c0_i32 = arith.constant 0 : i32
    %c0_i32_0 = arith.constant 0 : i32
    return %c0_i32, %arg0 : i32, i32
  }
  func.func @transform_1(%arg0: i32) -> (i32, i32) {
    %c0_i32 = arith.constant 0 : i32
    %c0_i32_0 = arith.constant 0 : i32
    return %c0_i32, %arg0 : i32, i32
  }
  func.func @transform_2(%arg0: i32) -> (i32, i32) {
    %c0_i32 = arith.constant 0 : i32
    %c0_i32_0 = arith.constant 0 : i32
    %c0_i32_1 = arith.constant 0 : i32
    return %c0_i32, %c0_i32_0 : i32, i32
  }
  func.func @transform_3(%arg0: i32) -> (i32, i32) {
    %c0_i32 = arith.constant 0 : i32
    %c0_i32_0 = arith.constant 0 : i32
    %c0_i32_1 = arith.constant 0 : i32
    return %c0_i32, %c0_i32_0 : i32, i32
  }
  func.func @transform_4(%arg0: i32) -> (i32, i32) {
    %c0_i32 = arith.constant 0 : i32
    %c0_i32_0 = arith.constant 0 : i32
    %c0_i32_1 = arith.constant 0 : i32
    return %c0_i32, %c0_i32_0 : i32, i32
  }
  func.func @transform_5(%arg0: i32) -> (i32, i32) {
    %c0_i32 = arith.constant 0 : i32
    %c0_i32_0 = arith.constant 0 : i32
    %c0_i32_1 = arith.constant 0 : i32
    return %c0_i32, %c0_i32_0 : i32, i32
  }
  func.func @transform_6(%arg0: i32) -> (i32, i32) {
    %c0_i32 = arith.constant 0 : i32
    %c0_i32_0 = arith.constant 0 : i32
    %c0_i32_1 = arith.constant 0 : i32
    return %c0_i32, %c0_i32_0 : i32, i32
  }
  func.func @transform_7(%arg0: i32) -> (i32, i32) {
    %c0_i32 = arith.constant 0 : i32
    %c0_i32_0 = arith.constant 0 : i32
    %c0_i32_1 = arith.constant 0 : i32
    return %c0_i32, %c0_i32_0 : i32, i32
  }
  func.func @transform_8(%arg0: i32) -> (i32, i32) {
    %c0_i32 = arith.constant 0 : i32
    %c0_i32_0 = arith.constant 0 : i32
    return %c0_i32, %arg0 : i32, i32
  }
  func.func @transform_9(%arg0: i32) -> (i32, i32) {
    %c0_i32 = arith.constant 0 : i32
    %c0_i32_0 = arith.constant 0 : i32
    return %c0_i32, %arg0 : i32, i32
  }
}

</mosaic_0001>

<bundles_post_ra>
// kernel: agent_forward.1
= control target key start
LH: loop header
LB: loop body
LE: loop exit
PB: predicated region body
PF: predicated region fallthrough
CT: control target
= control target key end

     0   :  { %s1295_s0 = inlined_call_operand.vmem [shape: f32[4,128], index: 0, kind: input, shape index: {}]   ;;  %s1296_s1 = inlined_call_operand.vmem [shape: f32[1,128], index: 1, kind: input, shape index: {}]   ;;  %s1297_s2 = inlined_call_operand.hbm [shape: f32[128,4], index: 2, kind: input, shape index: {}]   ;;  %s1298_s3 = inlined_call_operand.hbm [shape: f32[128,1], index: 3, kind: input, shape index: {}]   ;;  %s1299_s4 = inlined_call_operand.hbm [shape: bf16[128,128], index: 4, kind: input, shape index: {}]   ;;  %s1300_s5 = inlined_call_operand.hbm [shape: f32[128,1], index: 5, kind: input, shape index: {}]   ;;  %s1301_s6 = inlined_call_operand.vmem [shape: f32[1,128], index: 6, kind: input, shape index: {}]   ;;  %s1302_s7 = inlined_call_operand.<no memory space> [shape: f32[1,1], index: 7, kind: input, shape index: {}]   ;;  %s1303_s8 = inlined_call_operand.vmem [shape: f32[1,128], index: 8, kind: output, shape index: {0}]   ;;  %s1304_s9 = inlined_call_operand.vmem [shape: s32[1,128], index: 9, kind: output, shape index: {1}]  }
   0x1   :  { %v15_v0 = vstv %s1302_s7 }
   0x2   :  { %16 = vst [vmem:[#allocation2] sm:$0x1] %v15_v0 }
   0x3   :  { %17 = vsyncpa [#allocation4], 0 }
   0x4   :  { %18 = vsyncpa [#allocation6], 0 }
   0x5   :  { %19 = vsyncpa [#allocation9], 0  ;;  %s1124_s11 = smov [#allocation5]   ;;  %s1125_s13 = smov [#allocation3]  }
   0x6   :  { %s41_s12 = sshll.u32 %s1124_s11, 4  ;;  %s29_s14 = sshll.u32 %s1125_s13, 4  ;;  %s42_s12 = int_to_ptr.vmem [resolvable:$true] %s41_s12  ;;  %s1189_s14 = int_to_ptr.vmem [resolvable:$true] %s29_s14 }
   0x7   :  { %s1030_s17 = scalar_lea.hbm %s1298_s3, 2048 }
   0x8   :  { %p1031_p0 = scmp.ne.s32.totalorder %s1298_s3, %s1030_s17  ;;  %p1034_p1 = scmp.lt.u32.totalorder %s1030_s17, %s1298_s3 }
   0xa   :  { %p1036_p2 = pnand %p1034_p1, %p1031_p0 }
   0xc   :  { %1039 = shalt.err (!%p1036_p2)
}
   0xd   :  { %s1040_s21 = scalar_lea.vmem %s42_s12, 2048  ;;  %p1045_p4 = scmp.lt.s32.totalorder %s42_s12, %s42_s12 }
   0xe   :  { %p1041_p3 = scmp.ne.s32.totalorder %s42_s12, %s1040_s21  ;;  %p1046_p5 = scmp.lt.s32.totalorder %s1040_s21, %s1040_s21 }
  0x10   :  { %p1047_p6 = por %p1046_p5, %p1045_p4 }
  0x12   :  { %p1048_p7 = pnand %p1047_p6, %p1041_p3 }
  0x14   :  { %1051 = shalt.err (!%p1048_p7)
}
  0x15   :  { %s1126_s22 = smov 128   ;;  %s1127_s23 = smov 8  }
  0x16   :  { %47 = dma.hbm_to_vmem [thread:$0]  %s1298_s3, 2048, %s42_s12, [#allocation6], %s1126_s22, %s1126_s22, %s1127_s23  }
  0x17   :  { %s1052_s28 = scalar_lea.hbm %s1297_s2, 2048 }
  0x18   :  { %p1053_p8 = scmp.ne.s32.totalorder %s1297_s2, %s1052_s28  ;;  %p1056_p9 = scmp.lt.u32.totalorder %s1052_s28, %s1297_s2 }
  0x1a   :  { %p1058_p10 = pnand %p1056_p9, %p1053_p8 }
  0x1c   :  { %1061 = shalt.err (!%p1058_p10)
}
  0x1d   :  { %s1062_s13 = scalar_lea.vmem %s1189_s14, 2048  ;;  %p1067_p12 = scmp.lt.s32.totalorder %s1189_s14, %s1189_s14 }
  0x1e   :  { %p1063_p11 = scmp.ne.s32.totalorder %s1189_s14, %s1062_s13  ;;  %p1068_p13 = scmp.lt.s32.totalorder %s1062_s13, %s1062_s13 }
  0x20   :  { %p1069_p0 = por %p1068_p13, %p1067_p12 }
  0x22   :  { %p1070_p1 = pnand %p1069_p0, %p1063_p11 }
  0x24   :  { %1073 = shalt.err (!%p1070_p1)
}
  0x25   :  { %35 = dma.hbm_to_vmem [thread:$0]  %s1297_s2, 2048, %s1189_s14, [#allocation4], %s1126_s22, %s1126_s22, %s1127_s23  }
  0x26   :  { %s1128_s15 = smov [#allocation7]   ;;  %s1074_s19 = scalar_lea.hbm %s1299_s4, 1024 }
  0x27   :  { %s53_s16 = sshll.u32 %s1128_s15, 4  ;;  %p1075_p2 = scmp.ne.s32.totalorder %s1299_s4, %s1074_s19  ;;  %s54_s16 = int_to_ptr.vmem [resolvable:$true] %s53_s16 }
  0x28   :  { %p1078_p3 = scmp.lt.u32.totalorder %s1074_s19, %s1299_s4 }
  0x2a   :  { %p1080_p4 = pnand %p1078_p3, %p1075_p2 }
  0x2c   :  { %1083 = shalt.err (!%p1080_p4)
}
  0x2d   :  { %s1084_s25 = scalar_lea.vmem %s54_s16, 1024  ;;  %p1089_p6 = scmp.lt.s32.totalorder %s54_s16, %s54_s16 }
  0x2e   :  { %p1085_p5 = scmp.ne.s32.totalorder %s54_s16, %s1084_s25  ;;  %p1090_p7 = scmp.lt.s32.totalorder %s1084_s25, %s1084_s25 }
  0x30   :  { %p1091_p8 = por %p1090_p7, %p1089_p6 }
  0x32   :  { %p1092_p9 = pnand %p1091_p8, %p1085_p5 }
  0x34   :  { %1095 = shalt.err (!%p1092_p9)
}
  0x35   :  { %s1129_s2 = smov 64   ;;  %s1130_s14 = smov 4  }
  0x36   :  { %59 = dma.hbm_to_vmem [thread:$0]  %s1299_s4, 1024, %s54_s16, [#allocation6], %s1129_s2, %s1129_s2, %s1130_s14  }
  0x37   :  { %s1131_s28 = smov [#allocation8]   ;;  %s1096_s11 = scalar_lea.hbm %s1300_s5, 2048 }
  0x38   :  { %s65_s29 = sshll.u32 %s1131_s28, 4  ;;  %p1097_p10 = scmp.ne.s32.totalorder %s1300_s5, %s1096_s11  ;;  %s66_s29 = int_to_ptr.vmem [resolvable:$true] %s65_s29 }
  0x39   :  { %p1100_p11 = scmp.lt.u32.totalorder %s1096_s11, %s1300_s5 }
  0x3b   :  { %p1102_p12 = pnand %p1100_p11, %p1097_p10 }
  0x3d   :  { %1105 = shalt.err (!%p1102_p12)
}
  0x3e   :  { %s1106_s17 = scalar_lea.vmem %s66_s29, 2048  ;;  %p1111_p0 = scmp.lt.s32.totalorder %s66_s29, %s66_s29 }
  0x3f   :  { %p1107_p13 = scmp.ne.s32.totalorder %s66_s29, %s1106_s17  ;;  %p1112_p1 = scmp.lt.s32.totalorder %s1106_s17, %s1106_s17 }
  0x41   :  { %p1113_p2 = por %p1112_p1, %p1111_p0 }
  0x43   :  { %p1114_p3 = pnand %p1113_p2, %p1107_p13 }
  0x45   :  { %1117 = shalt.err (!%p1114_p3)
}
  0x46   :  { %71 = dma.hbm_to_vmem [thread:$0]  %s1300_s5, 2048, %s66_s29, [#allocation9], %s1126_s22, %s1126_s22, %s1127_s23  }
  0x47   :  { %1118 = dma.done.wait [#allocation4], 2048  }
  0x48   :  { %1119 = vsyncadd [#allocation4], 4294965248 }
  0x49   :  { %1120 = dma.done.wait [#allocation6], 3072  }
  0x4a   :  { %1121 = vsyncadd [#allocation6], 4294964224 }
  0x4b   :  { %1122 = dma.done.wait [#allocation9], 2048  }
  0x4c   :  { %1123 = vsyncadd [#allocation9], 4294965248  ;;  %v1132_v1 = vmov 0   ;;  %vm251_vm0 = vcmask 1043456   ;;  %vm202_vm1 = vcmask 31744   ;;  %v89_v3 = vld [vmem:[#allocation3] sm:$0xff] }
  0x4d   :  { %1014 = vset.pattern.permute.xlu0 %v1132_v1  ;;  %1015 = vset.pattern.permute.xlu1 %v1132_v1  ;;  %v105_v2 = vld [vmem:[%s1295_s0] sm:$0xf]  ;;  %v90_v4 = vld [vmem:[#allocation3 + $0x8] sm:$0xff]  ;;  %v91_v5 = vld [vmem:[#allocation3 + $0x10] sm:$0xff]  ;;  %vm1134_vm2 = vmmov 0  }
  0x4e   :  { %885 = vmatprep.subr.msk.mxu0 %vm251_vm0, %v105_v2  ;;  %887 = vmatprep.mubr.msk.f32.mxu0 %vm202_vm1, %v89_v3  ;;  %v106_v6 = vld [vmem:[#allocation5] sm:$0xff]  ;;  %v92_v7 = vld [vmem:[#allocation3 + $0x18] sm:$0xff]  ;;  %v107_v9 = vld [vmem:[#allocation5 + $0x8] sm:$0xff] }
  0x4f   :  { %886 = vmatpush3.msk.msra.mxu0 %vm251_vm0, %v105_v2  ;;  %124 = vperm.xlu0 %1014, %v106_v6   ;;  %v93_v8 = vld [vmem:[#allocation3 + $0x20] sm:$0xff]  ;;  %v108_v10 = vld [vmem:[#allocation5 + $0x10] sm:$0xff]  ;;  %v109_v11 = vld [vmem:[#allocation5 + $0x18] sm:$0xff] }
  0x50   :  { %888 = vmatmul.mubr.msk.f32.vlgmr.msra.gmra.mrb[0].mxu0 %vm202_vm1, %v90_v4  ;;  %134 = vperm.xlu1 %1015, %v108_v10   ;;  %v94_v12 = vld [vmem:[#allocation3 + $0x28] sm:$0xff]  ;;  %v95_v13 = vld [vmem:[#allocation3 + $0x30] sm:$0xff]  ;;  %v110_v14 = vld [vmem:[#allocation5 + $0x20] sm:$0xff] }
  0x51   :  { %890 = vmatprep.mubr.msk.f32.mxu0 %vm202_vm1, %v91_v5  ;;  %v111_v15 = vld [vmem:[#allocation5 + $0x28] sm:$0xff]  ;;  %v96_v16 = vld [vmem:[#allocation3 + $0x38] sm:$0xff]  ;;  %v97_v17 = vld [vmem:[#allocation3 + $0x40] sm:$0xff] }
  0x52   :  { %v112_v18 = vld [vmem:[#allocation5 + $0x30] sm:$0xff]  ;;  %v98_v19 = vld [vmem:[#allocation3 + $0x48] sm:$0xff]  ;;  %v113_v20 = vld [vmem:[#allocation5 + $0x38] sm:$0xff] }
  0x53   :  { %129 = vperm.xlu0 %1014, %v107_v9   ;;  %v99_v21 = vld [vmem:[#allocation3 + $0x50] sm:$0xff]  ;;  %v114_v22 = vld [vmem:[#allocation5 + $0x40] sm:$0xff]  ;;  %v115_v23 = vld [vmem:[#allocation5 + $0x48] sm:$0xff] }
  0x54   :  { %891 = vmatmul.mubr.msk.f32.gmra.mrb[2].mxu0 %vm202_vm1, %v92_v7  ;;  %139 = vperm.xlu1 %1015, %v109_v11   ;;  %v100_v24 = vld [vmem:[#allocation3 + $0x58] sm:$0xff]  ;;  %v101_v25 = vld [vmem:[#allocation3 + $0x60] sm:$0xff]  ;;  %v116_v26 = vld [vmem:[#allocation5 + $0x50] sm:$0xff] }
  0x55   :  { %893 = vmatprep.mubr.msk.f32.mxu0 %vm202_vm1, %v93_v8  ;;  %v117_v27 = vld [vmem:[#allocation5 + $0x58] sm:$0xff]  ;;  %v102_v28 = vld [vmem:[#allocation3 + $0x68] sm:$0xff]  ;;  %v103_v29 = vld [vmem:[#allocation3 + $0x70] sm:$0xff] }
  0x56   :  { %v118_v30 = vld [vmem:[#allocation5 + $0x60] sm:$0xff]  ;;  %v119_v31 = vld [vmem:[#allocation5 + $0x68] sm:$0xff]  ;;  %v104_v32 = vld [vmem:[#allocation3 + $0x78] sm:$0xff] }
  0x57   :  { %144 = vperm.xlu0 %1014, %v110_v14   ;;  %v120_v33 = vld [vmem:[#allocation5 + $0x70] sm:$0xff]  ;;  %v121_v34 = vld [vmem:[#allocation5 + $0x78] sm:$0xff]  ;;  %v440_v35 = vld [vmem:[#allocation8] sm:$0xff] }
  0x58   :  { %894 = vmatmul.mubr.msk.f32.gmra.mrb[4].mxu0 %vm202_vm1, %v94_v12  ;;  %149 = vperm.xlu1 %1015, %v111_v15   ;;  %v441_v36 = vld [vmem:[#allocation8 + $0x8] sm:$0xff]  ;;  %v442_v37 = vld [vmem:[#allocation8 + $0x10] sm:$0xff]  ;;  %v443_v38 = vld [vmem:[#allocation8 + $0x18] sm:$0xff] }
  0x59   :  { %896 = vmatprep.mubr.msk.f32.mxu0 %vm202_vm1, %v95_v13  ;;  %v444_v39 = vld [vmem:[#allocation8 + $0x20] sm:$0xff]  ;;  %v445_v40 = vld [vmem:[#allocation8 + $0x28] sm:$0xff]  ;;  %v446_v41 = vld [vmem:[#allocation8 + $0x30] sm:$0xff] }
  0x5a   :  { %v447_v42 = vld [vmem:[#allocation8 + $0x38] sm:$0xff]  ;;  %v448_v43 = vld [vmem:[#allocation8 + $0x40] sm:$0xff]  ;;  %v449_v44 = vld [vmem:[#allocation8 + $0x48] sm:$0xff] }
  0x5b   :  { %154 = vperm.xlu0 %1014, %v112_v18   ;;  %v450_v45 = vld [vmem:[#allocation8 + $0x50] sm:$0xff]  ;;  %v451_v46 = vld [vmem:[#allocation8 + $0x58] sm:$0xff]  ;;  %v452_v47 = vld [vmem:[#allocation8 + $0x60] sm:$0xff] }
  0x5c   :  { %897 = vmatmul.mubr.msk.f32.gmra.mrb[6].mxu0 %vm202_vm1, %v96_v16  ;;  %159 = vperm.xlu1 %1015, %v113_v20   ;;  %v453_v48 = vld [vmem:[#allocation8 + $0x68] sm:$0xff]  ;;  %v454_v49 = vld [vmem:[#allocation8 + $0x70] sm:$0xff]  ;;  %v455_v50 = vld [vmem:[#allocation8 + $0x78] sm:$0xff] }
  0x5d   :  { %899 = vmatprep.mubr.msk.f32.mxu0 %vm202_vm1, %v97_v17  ;;  %v698_v51 = vld [vmem:[#allocation2] sm:$0x1]  ;;  %v1016_v52 = vld [vmem:[#allocation7] sm:$0xff]  }
  0x5e   :  { %927 = vmatprep.mubr.bf16.mxu1 %v1016_v52 }
  0x5f   :  { %164 = vperm.xlu0 %1014, %v114_v22  }
  0x60   :  { %900 = vmatmul.mubr.msk.f32.gmra.mrb[8].mxu0 %vm202_vm1, %v98_v19  ;;  %169 = vperm.xlu1 %1015, %v115_v23  }
  0x61   :  { %902 = vmatprep.mubr.msk.f32.mxu0 %vm202_vm1, %v99_v21 }
  0x63   :  { %174 = vperm.xlu0 %1014, %v116_v26  }
  0x64   :  { %903 = vmatmul.mubr.msk.f32.gmra.mrb[10].mxu0 %vm202_vm1, %v100_v24  ;;  %179 = vperm.xlu1 %1015, %v117_v27  }
  0x65   :  { %905 = vmatprep.mubr.msk.f32.mxu0 %vm202_vm1, %v101_v25 }
  0x67   :  { %184 = vperm.xlu0 %1014, %v118_v30  }
  0x68   :  { %906 = vmatmul.mubr.msk.f32.gmra.mrb[12].mxu0 %vm202_vm1, %v102_v28  ;;  %189 = vperm.xlu1 %1015, %v119_v31  }
  0x69   :  { %908 = vmatprep.mubr.msk.f32.mxu0 %vm202_vm1, %v103_v29 }
  0x6b   :  { %194 = vperm.xlu0 %1014, %v120_v33  }
  0x6c   :  { %909 = vmatmul.mubr.msk.f32.gmra.mrb[14].mxu0 %vm202_vm1, %v104_v32  ;;  %199 = vperm.xlu1 %1015, %v121_v34  }
  0x6f   :  { %458 = vperm.xlu0 %1014, %v440_v35  }
  0x70   :  { %463 = vperm.xlu1 %1015, %v441_v36  }
  0x73   :  { %468 = vperm.xlu0 %1014, %v442_v37  }
  0x74   :  { %473 = vperm.xlu1 %1015, %v443_v38  }
  0x77   :  { %478 = vperm.xlu0 %1014, %v444_v39  }
  0x78   :  { %483 = vperm.xlu1 %1015, %v445_v40  }
  0x7b   :  { %488 = vperm.xlu0 %1014, %v446_v41  }
  0x7c   :  { %493 = vperm.xlu1 %1015, %v447_v42  }
  0x7f   :  { %498 = vperm.xlu0 %1014, %v448_v43  }
  0x80   :  { %503 = vperm.xlu1 %1015, %v449_v44  }
  0x83   :  { %508 = vperm.xlu0 %1014, %v450_v45  }
  0x84   :  { %513 = vperm.xlu1 %1015, %v451_v46  }
  0x87   :  { %518 = vperm.xlu0 %1014, %v452_v47  }
  0x88   :  { %523 = vperm.xlu1 %1015, %v453_v48  }
  0x8b   :  { %528 = vperm.xlu0 %1014, %v454_v49  }
  0x8c   :  { %533 = vperm.xlu1 %1015, %v455_v50  }
  0x8f   :  { %701 = vperm.xlu0 %1014, %v698_v51  }
  0xce   :  { %v125_v54 = vpop.permute.xlu0 %124 }
  0xcf   :  { %v135_v53 = vpop.permute.xlu1 %134 }
  0xd2   :  { %v130_v56 = vpop.permute.xlu0 %129 }
  0xd3   :  { %v140_v55 = vpop.permute.xlu1 %139 }
  0xd6   :  { %v145_v58 = vpop.permute.xlu0 %144 }
  0xd7   :  { %v150_v57 = vpop.permute.xlu1 %149 }
  0xda   :  { %v155_v4 = vpop.permute.xlu0 %154 }
  0xdb   :  { %v160_v0 = vpop.permute.xlu1 %159 }
  0xde   :  { %v165_v17 = vpop.permute.xlu0 %164 }
  0xdf   :  { %v170_v14 = vpop.permute.xlu1 %169 }
  0xe2   :  { %v175_v29 = vpop.permute.xlu0 %174 }
  0xe3   :  { %v180_v26 = vpop.permute.xlu1 %179 }
  0xe6   :  { %v185_v42 = vpop.permute.xlu0 %184 }
  0xe7   :  { %v190_v39 = vpop.permute.xlu1 %189 }
  0xeb   :  { %v200_v51 = vpop.permute.xlu1 %199 }
 0x123   :  { %v889_v59 = vpop.f32.mrb[0].mxu0 }
 0x124   :  { %v327_v60 = vadd.f32 %v889_v59, %v130_v56  ;;  %v321_v61 = vpop.f32.mrb[1].mxu0 }
 0x125   :  { %v322_v62 = vadd.f32 %v321_v61, %v125_v54  ;;  %v195_v54 = vpop.permute.xlu0 %194 }
 0x126   :  { %v401_v63 = vmax.f32 %v327_v60, 0.0 }
 0x127   :  { %v400_v2 = vmax.f32 %v322_v62, 0.0  ;;  %v892_v3 = vpop.f32.mrb[2].mxu0  ;;  %v1017_v62 = vld [vmem:[#allocation7 + $0x8] sm:$0xff]  }
 0x128   :  { %v337_v5 = vadd.f32 %v892_v3, %v140_v55  ;;  %v331_v6 = vpop.f32.mrb[3].mxu0  ;;  %v1021_v3 = vld [vmem:[#allocation7 + $0x28] sm:$0xff]  }
 0x129   :  { %v332_v7 = vadd.f32 %v331_v6, %v135_v53  ;;  %v416_v8 = vpack.c.bf16 %v401_v63, %v400_v2  ;;  %v1018_v63 = vld [vmem:[#allocation7 + $0x10] sm:$0xff]   ;;  %v1020_v2 = vld [vmem:[#allocation7 + $0x20] sm:$0xff]   ;;  %v1133_v6 = vmov 0.0|0.0  }
 0x12a   :  { %v403_v9 = vmax.f32 %v337_v5, 0.0  ;;  %v1023_v5 = vld [vmem:[#allocation7 + $0x38] sm:$0xff]   ;;  %978 = vmatprep.subr.bf16.mxu0 %v1133_v6 }
 0x12b   :  { %v402_v10 = vmax.f32 %v332_v7, 0.0  ;;  %v895_v11 = vpop.f32.mrb[4].mxu0  ;;  %911 = vmatprep.subr.bf16.mxu1 %v416_v8  ;;  %v1135_v7 = vmov 0.0  }
 0x12c   :  { %v347_v12 = vadd.f32 %v895_v11, %v150_v57  ;;  %v341_v13 = vpop.f32.mrb[5].mxu0  ;;  %912 = vmatpush3.bf16.msra.mxu1 %v416_v8  ;;  %975 = vmatprep.mubr.msk.f32.mxu0 %vm1134_vm2, %v1135_v7  ;;  %v459_v8 = vpop.permute.xlu0 %458 }
 0x12d   :  { %v417_v15 = vpack.c.bf16 %v403_v9, %v402_v10  ;;  %v342_v16 = vadd.f32 %v341_v13, %v145_v58  ;;  %v464_v9 = vpop.permute.xlu1 %463 }
 0x12e   :  { %v405_v18 = vmax.f32 %v347_v12, 0.0 }
 0x12f   :  { %v404_v19 = vmax.f32 %v342_v16, 0.0  ;;  %v898_v20 = vpop.f32.mrb[6].mxu0  ;;  %913 = vmatprep.subr.bf16.mxu1 %v417_v15 }
 0x130   :  { %v357_v21 = vadd.f32 %v898_v20, %v160_v0  ;;  %v351_v22 = vpop.f32.mrb[7].mxu0  ;;  %914 = vmatpush3.bf16.msra.mxu1 %v417_v15  ;;  %v1019_v0 = vld [vmem:[#allocation7 + $0x18] sm:$0xff]   ;;  %v469_v10 = vpop.permute.xlu0 %468 }
 0x131   :  { %v418_v23 = vpack.c.bf16 %v405_v18, %v404_v19  ;;  %v352_v24 = vadd.f32 %v351_v22, %v155_v4  ;;  %v1022_v4 = vld [vmem:[#allocation7 + $0x30] sm:$0xff]   ;;  %v474_v11 = vpop.permute.xlu1 %473 }
 0x132   :  { %v407_v25 = vmax.f32 %v357_v21, 0.0 }
 0x133   :  { %v406_v27 = vmax.f32 %v352_v24, 0.0  ;;  %v901_v28 = vpop.f32.mrb[8].mxu0  ;;  %915 = vmatprep.subr.bf16.mxu1 %v418_v23 }
 0x134   :  { %v367_v30 = vadd.f32 %v901_v28, %v170_v14  ;;  %v361_v31 = vpop.f32.mrb[9].mxu0  ;;  %916 = vmatpush3.bf16.msra.mxu1 %v418_v23  ;;  %v479_v12 = vpop.permute.xlu0 %478 }
 0x135   :  { %v419_v32 = vpack.c.bf16 %v407_v25, %v406_v27  ;;  %v362_v33 = vadd.f32 %v361_v31, %v165_v17  ;;  %v484_v13 = vpop.permute.xlu1 %483 }
 0x136   :  { %v409_v34 = vmax.f32 %v367_v30, 0.0 }
 0x137   :  { %v408_v35 = vmax.f32 %v362_v33, 0.0  ;;  %v904_v36 = vpop.f32.mrb[10].mxu0  ;;  %917 = vmatprep.subr.bf16.mxu1 %v419_v32 }
 0x138   :  { %v377_v37 = vadd.f32 %v904_v36, %v180_v26  ;;  %v371_v38 = vpop.f32.mrb[11].mxu0  ;;  %918 = vmatpush3.bf16.msra.mxu1 %v419_v32  ;;  %v489_v14 = vpop.permute.xlu0 %488 }
 0x139   :  { %v420_v40 = vpack.c.bf16 %v409_v34, %v408_v35  ;;  %v372_v41 = vadd.f32 %v371_v38, %v175_v29  ;;  %v494_v18 = vpop.permute.xlu1 %493 }
 0x13a   :  { %v411_v43 = vmax.f32 %v377_v37, 0.0 }
 0x13b   :  { %v410_v44 = vmax.f32 %v372_v41, 0.0  ;;  %v907_v45 = vpop.f32.mrb[12].mxu0  ;;  %919 = vmatprep.subr.bf16.mxu1 %v420_v40 }
 0x13c   :  { %v387_v46 = vadd.f32 %v907_v45, %v190_v39  ;;  %v381_v47 = vpop.f32.mrb[13].mxu0  ;;  %920 = vmatpush3.bf16.msra.mxu1 %v420_v40  ;;  %v499_v26 = vpop.permute.xlu0 %498 }
 0x13d   :  { %v421_v48 = vpack.c.bf16 %v411_v43, %v410_v44  ;;  %v382_v49 = vadd.f32 %v381_v47, %v185_v42  ;;  %v504_v30 = vpop.permute.xlu1 %503 }
 0x13e   :  { %v413_v50 = vmax.f32 %v387_v46, 0.0 }
 0x13f   :  { %v412_v52 = vmax.f32 %v382_v49, 0.0  ;;  %v910_v53 = vpop.f32.mrb[14].mxu0  ;;  %921 = vmatprep.subr.bf16.mxu1 %v421_v48 }
 0x140   :  { %v397_v55 = vadd.f32 %v910_v53, %v200_v51  ;;  %v391_v56 = vpop.f32.mrb[15].mxu0  ;;  %922 = vmatpush3.bf16.msra.mxu1 %v421_v48  ;;  %v509_v39 = vpop.permute.xlu0 %508 }
 0x141   :  { %v422_v57 = vpack.c.bf16 %v413_v50, %v412_v52  ;;  %v392_v58 = vadd.f32 %v391_v56, %v195_v54  ;;  %v514_v43 = vpop.permute.xlu1 %513 }
 0x142   :  { %v415_v59 = vmax.f32 %v397_v55, 0.0 }
 0x143   :  { %v414_v60 = vmax.f32 %v392_v58, 0.0  ;;  %923 = vmatprep.subr.bf16.mxu1 %v422_v57 }
 0x144   :  { %924 = vmatpush3.bf16.msra.mxu1 %v422_v57  ;;  %v519_v51 = vpop.permute.xlu0 %518 }
 0x145   :  { %v423_v61 = vpack.c.bf16 %v415_v59, %v414_v60  ;;  %v524_v56 = vpop.permute.xlu1 %523 }
 0x147   :  { %925 = vmatprep.subr.bf16.mxu1 %v423_v61 }
 0x148   :  { %926 = vmatpush3.bf16.msra.mxu1 %v423_v61 }
 0x14b   :  { %928 = vmatmul.mubr.bf16.vlgmr.msra.gmra.mrb[0].mxu1 %v1017_v62 }
 0x14c   :  { %931 = vmatprep.mubr.bf16.mxu1 %v1018_v63  ;;  %v529_v63 = vpop.permute.xlu0 %528 }
 0x153   :  { %932 = vmatmul.mubr.bf16.gmra.mrb[4].mxu1 %v1019_v0 }
 0x154   :  { %935 = vmatprep.mubr.bf16.mxu1 %v1020_v2 }
 0x15b   :  { %936 = vmatmul.mubr.bf16.gmra.mrb[8].mxu1 %v1021_v3 }
 0x15c   :  { %939 = vmatprep.mubr.bf16.mxu1 %v1022_v4 }
 0x163   :  { %940 = vmatmul.mubr.bf16.gmra.mrb[12].mxu1 %v1023_v5  ;;  %v534_v5 = vpop.permute.xlu1 %533 }
 0x21e   :  { %v929_v15 = vpop.f32.mrb[0].mxu1 }
 0x21f   :  { %v627_v16 = vadd.f32 %v929_v15, %v469_v10  ;;  %v618_v17 = vpop.f32.mrb[1].mxu1 }
 0x220   :  { %v619_v19 = vadd.f32 %v618_v17, %v459_v8  ;;  %v930_v20 = vpop.f32.mrb[2].mxu1 }
 0x221   :  { %v630_v21 = vadd.f32 %v930_v20, %v474_v11  ;;  %v621_v22 = vpop.f32.mrb[3].mxu1  ;;  %v683_v24 = vmax.f32 %v627_v16, 0.0 }
 0x222   :  { %v622_v23 = vadd.f32 %v621_v22, %v464_v9  ;;  %v681_v27 = vmax.f32 %v619_v19, 0.0  ;;  %v704_v19 = vlaneseq  ;;  %v702_v22 = vpop.permute.xlu0 %701 }
 0x223   :  { %v684_v25 = vmax.f32 %v630_v21, 0.0 }
 0x224   :  { %v682_v28 = vmax.f32 %v622_v23, 0.0  ;;  %v705_v20 = vshrl.u32 %v704_v19, 7 }
 0x225   :  { %v982_v29 = vpack.c.bf16 %v684_v25, %v683_v24 }
 0x226   :  { %v979_v31 = vpack.c.bf16 %v682_v28, %v681_v27  ;;  %v933_v32 = vpop.f32.mrb[4].mxu1  ;;  %v706_v21 = vsub.s32 0, %v705_v20 }
 0x227   :  { %v643_v33 = vadd.f32 %v933_v32, %v489_v14  ;;  %v634_v34 = vpop.f32.mrb[5].mxu1  ;;  %v778_v32 = vld [vmem:[%s1296_s1] sm:$0x1] }
 0x228   :  { %v635_v35 = vadd.f32 %v634_v34, %v479_v12  ;;  %v934_v36 = vpop.f32.mrb[6].mxu1  ;;  %980 = vmatpush3.bf16.msra.mxu0 %v979_v31  ;;  %v707_v23 = vrot.slane %v702_v22, %v706_v21 }
 0x229   :  { %v646_v37 = vadd.f32 %v934_v36, %v494_v18  ;;  %v637_v38 = vpop.f32.mrb[7].mxu1  ;;  %981 = vmatprep.subr.bf16.mxu0 %v1133_v6  ;;  %v687_v41 = vmax.f32 %v643_v33, 0.0  ;;  %v697_v18 = vld [vmem:[%s1301_s6] sm:$0x1] }
 0x22a   :  { %v638_v40 = vadd.f32 %v637_v38, %v484_v13  ;;  %v685_v44 = vmax.f32 %v635_v35, 0.0 }
 0x22b   :  { %v688_v42 = vmax.f32 %v646_v37, 0.0 }
 0x22c   :  { %v686_v45 = vmax.f32 %v638_v40, 0.0  ;;  %983 = vmatpush3.bf16.msra.mxu0 %v982_v29 }
 0x22d   :  { %v988_v46 = vpack.c.bf16 %v688_v42, %v687_v41  ;;  %984 = vmatprep.subr.bf16.mxu0 %v1133_v6 }
 0x22e   :  { %v985_v47 = vpack.c.bf16 %v686_v45, %v685_v44  ;;  %v937_v48 = vpop.f32.mrb[8].mxu1 }
 0x22f   :  { %v659_v49 = vadd.f32 %v937_v48, %v509_v39  ;;  %v650_v50 = vpop.f32.mrb[9].mxu1 }
 0x230   :  { %v651_v52 = vadd.f32 %v650_v50, %v499_v26  ;;  %v938_v53 = vpop.f32.mrb[10].mxu1  ;;  %986 = vmatpush3.bf16.msra.mxu0 %v985_v47 }
 0x231   :  { %v662_v54 = vadd.f32 %v938_v53, %v514_v43  ;;  %v653_v55 = vpop.f32.mrb[11].mxu1  ;;  %987 = vmatprep.subr.bf16.mxu0 %v1133_v6  ;;  %v691_v58 = vmax.f32 %v659_v49, 0.0 }
 0x232   :  { %v654_v57 = vadd.f32 %v653_v55, %v504_v30  ;;  %v689_v60 = vmax.f32 %v651_v52, 0.0 }
 0x233   :  { %v692_v59 = vmax.f32 %v662_v54, 0.0 }
 0x234   :  { %v690_v61 = vmax.f32 %v654_v57, 0.0  ;;  %989 = vmatpush3.bf16.msra.mxu0 %v988_v46 }
 0x235   :  { %v994_v62 = vpack.c.bf16 %v692_v59, %v691_v58  ;;  %990 = vmatprep.subr.bf16.mxu0 %v1133_v6 }
 0x236   :  { %v991_v0 = vpack.c.bf16 %v690_v61, %v689_v60  ;;  %v941_v2 = vpop.f32.mrb[12].mxu1 }
 0x237   :  { %v675_v3 = vadd.f32 %v941_v2, %v529_v63  ;;  %v666_v4 = vpop.f32.mrb[13].mxu1 }
 0x238   :  { %v667_v7 = vadd.f32 %v666_v4, %v519_v51  ;;  %v942_v8 = vpop.f32.mrb[14].mxu1  ;;  %992 = vmatpush3.bf16.msra.mxu0 %v991_v0 }
 0x239   :  { %v678_v9 = vadd.f32 %v942_v8, %v534_v5  ;;  %v669_v10 = vpop.f32.mrb[15].mxu1  ;;  %993 = vmatprep.subr.bf16.mxu0 %v1133_v6  ;;  %v695_v12 = vmax.f32 %v675_v3, 0.0 }
 0x23a   :  { %v670_v11 = vadd.f32 %v669_v10, %v524_v56  ;;  %v693_v14 = vmax.f32 %v667_v7, 0.0 }
 0x23b   :  { %v696_v13 = vmax.f32 %v678_v9, 0.0 }
 0x23c   :  { %v694_v15 = vmax.f32 %v670_v11, 0.0  ;;  %995 = vmatpush3.bf16.msra.mxu0 %v994_v62 }
 0x23d   :  { %v1000_v16 = vpack.c.bf16 %v696_v13, %v695_v12  ;;  %996 = vmatprep.subr.bf16.mxu0 %v1133_v6 }
 0x23e   :  { %v997_v17 = vpack.c.bf16 %v694_v15, %v693_v14 }
 0x240   :  { %998 = vmatpush3.bf16.msra.mxu0 %v997_v17 }
 0x241   :  { %999 = vmatprep.subr.bf16.mxu0 %v1133_v6 }
 0x244   :  { %1001 = vmatpush3.bf16.msra.mxu0 %v1000_v16 }
 0x247   :  { %976 = vmatmul.mubr.f32.vlgmr.msra.gmra.mrb[16].mxu0 %v697_v18 }
 0x31a   :  { %v774_v24 = vpop.f32.mrb[16].mxu0 }
 0x31b   :  { %v775_v25 = vadd.f32 %v774_v24, %v707_v23  ;;  %v977_v26 = vpop.f32.mrb[17].mxu0 }
 0x31d   :  { %v779_v27 = vand.u32 2147483647, %v775_v25  ;;  %vm785_vm3 = vcmp.ge.f32.partialorder %v775_v25, 0.0  ;;  %v789_v36 = vsub.f32 0.0, %v775_v25 }
 0x31f   :  { %v780_v28 = vsub.f32 0.0, %v779_v27 }
 0x321   :  { %v781_v29 = vmul.f32 1.442695, %v780_v28 }
 0x323   :  { %1024 = vpow2.f32 %v781_v29 }
 0x32d   :  { %v1025_v30 = vpop.eup %1024 }
 0x32e   :  { %v783_v6 = vadd.f32 1.0, %v1025_v30 }
 0x330   :  { %1026 = vrcp.f32 %v783_v6 }
 0x331   :  { %1028 = vlog2.f32 %v783_v6 }
 0x33a   :  { %v1027_v31 = vpop.eup %1026 }
 0x33b   :  { %v786_v33 = vmul.f32 %v1027_v31, %v1025_v30  ;;  %v1029_v34 = vpop.eup %1028 }
 0x33c   :  { %v793_v40 = vmul.f32 0.6931472, %v1029_v34 }
 0x33d   :  { %v787_v35 = vsel %vm785_vm3, %v786_v33, %v1027_v31 }
 0x33e   :  { %vm788_vm4 = vcmp.lt.f32.partialorder %v787_v35, %v778_v32 }
 0x33f   :  { %v790_v37 = vsel %vm788_vm4, %v789_v36, %v775_v25  ;;  %v797_v38 = vsel %vm788_vm4, 1, %v1132_v1 }
 0x340   :  { %v791_v39 = vmax.f32 %v790_v37, 0.0  ;;  %798 = vst [vmem:[%s1304_s9] sm:$0x1] %v797_v38 }
 0x342   :  { %v794_v41 = vadd.f32 %v793_v40, %v791_v39 }
 0x344   :  { %v795_v42 = vsub.f32 0.0, %v794_v41 }
 0x346   :  { %796 = vst [vmem:[%s1303_s8] sm:$0x1] %v795_v42 }
 0x347   :  { %807 = vsyncpa [#allocation4], 1 }
 0x348   :  { %808 = vsyncpa [#allocation6], 1 }
 0x349   :  { %809 = vsyncpa [#allocation9], 1 }

</bundles_post_ra>
